<compile_context>
chip_gen: v5e
topology: v5e:2x2
jax: 0.10.0
libtpu: 0.0.40
codegen_flags: <defaults>
</compile_context>

<pallas_src>
import jax
import jax.numpy as jnp
from jax.experimental import pallas as pl
from jax.experimental.pallas import tpu as pltpu


def decoder_kernel(x_ref, w1_ref, b1_ref, w2_ref, b2_ref, o_ref):
    # x_ref: (TB, Din)   w1_ref: (Din, H)   b1_ref: (1, H)
    # w2_ref: (H, Ep)    b2_ref: (1, Ep)    o_ref: (TB, Ep)
    h = jnp.dot(x_ref[...], w1_ref[...], preferred_element_type=jnp.float32)
    h = jnp.maximum(h + b1_ref[...], 0.0)                       # Linear1 + ReLU
    out = jnp.dot(h, w2_ref[...], preferred_element_type=jnp.float32)
    out = out + b2_ref[...]                                     # Linear2
    o_ref[...] = out.astype(o_ref.dtype)


def _choose_tb(batch, row_bytes):
    # Target ~2 MiB input blocks (double-buffered -> ~4 MiB), multiple of 8.
    tb = max(8, (2 * 1024 * 1024) // max(row_bytes, 1))
    tb = max(8, (tb // 8) * 8)
    b_pad = ((batch + 7) // 8) * 8
    tb = min(tb, b_pad)
    # Keep >= 2 grid steps when possible so v7x's two TensorCores both get work.
    if b_pad // tb < 2 and b_pad >= 16:
        tb = max(8, ((b_pad // 2) // 8) * 8)
    return tb


def user_aspect_embedding_decoder(a_m_u, W1, b1, W2, b2, *, tb=None):
    """a_m_u: (B, A, E) f32. W1: (A*E, H), b1: (H,), W2: (H, E), b2: (E,)."""
    B = a_m_u.shape[0]
    x = a_m_u.reshape(B, -1)                       # == a_m_u.view(batch, -1)
    Din = x.shape[1]
    H = W1.shape[1]
    E = W2.shape[1]
    assert W1.shape[0] == Din and b1.shape == (H,)
    assert W2.shape[0] == H and b2.shape == (E,)

    # Lane-dense output: pad output feature dim to a multiple of 128.
    Ep = ((E + 127) // 128) * 128
    W2p = jnp.zeros((H, Ep), W2.dtype).at[:, :E].set(W2)
    b2p = jnp.zeros((1, Ep), b2.dtype).at[:, :E].set(b2)
    b1r = b1.reshape(1, H)

    if tb is None:
        tb = _choose_tb(B, Din * x.dtype.itemsize)
    Bp = ((B + tb - 1) // tb) * tb
    if Bp != B:
        x = jnp.pad(x, ((0, Bp - B), (0, 0)))

    out = pl.pallas_call(
        decoder_kernel,
        out_shape=jax.ShapeDtypeStruct((Bp, Ep), x.dtype),
        grid_spec=pltpu.PrefetchScalarGridSpec(
            num_scalar_prefetch=0,
            grid=(Bp // tb,),
            in_specs=[
                pl.BlockSpec((tb, Din), lambda i: (i, 0)),   # batch tile of x
                pl.BlockSpec((Din, H), lambda i: (0, 0)),    # W1 resident
                pl.BlockSpec((1, H), lambda i: (0, 0)),      # b1 resident
                pl.BlockSpec((H, Ep), lambda i: (0, 0)),     # W2 (padded) resident
                pl.BlockSpec((1, Ep), lambda i: (0, 0)),     # b2 (padded) resident
            ],
            out_specs=pl.BlockSpec((tb, Ep), lambda i: (i, 0)),
        ),
        compiler_params=pltpu.CompilerParams(
            dimension_semantics=("parallel",),
            vmem_limit_bytes=48 * 1024 * 1024,
        ),
    )(x, W1, b1r, W2p, b2p)
    return out[:B, :E]


if __name__ == "__main__":
    # Small shapes consistent with the module: batch=16, num_aspects=4,
    # embedding_aspect=32, hidden_dim=64  (input feature dim = 4*32 = 128).
    B, A, E, H = 16, 4, 32, 64
    Din = A * E

    key = jax.random.PRNGKey(0)
    k1, k2, k3, k4, k5 = jax.random.split(key, 5)

    # Parameter init mirroring nn.Linear's default uniform(-1/sqrt(fan_in), ...).
    bound1 = 1.0 / (Din ** 0.5)
    bound2 = 1.0 / (H ** 0.5)
    W1 = jax.random.uniform(k1, (Din, H), jnp.float32, -bound1, bound1)
    b1 = jax.random.uniform(k2, (H,), jnp.float32, -bound1, bound1)
    W2 = jax.random.uniform(k3, (H, E), jnp.float32, -bound2, bound2)
    b2 = jax.random.uniform(k4, (E,), jnp.float32, -bound2, bound2)

    a_m_u = jax.random.normal(k5, (B, A, E), dtype=jnp.float32)

    out = user_aspect_embedding_decoder(a_m_u, W1, b1, W2, b2)
    out = jax.block_until_ready(out)

    # Pure-JAX reference for a quiet correctness check.
    x_ref = a_m_u.reshape(B, -1)
    ref = jnp.maximum(x_ref @ W1 + b1, 0.0) @ W2 + b2

    assert out.shape == (B, E)
    assert jnp.allclose(out, ref, atol=1e-2, rtol=1e-2), "mismatch vs reference"

    print("KERNEL_OK")
</pallas_src>

<mosaic_0001>
module attributes {stable_mosaic.version = 11 : i64} {
  func.func @decoder_kernel(%arg0: i32, %arg1: memref<8x128xf32, #tpu.memory_space<vmem>>, %arg2: memref<128x64xf32, #tpu.memory_space<vmem>>, %arg3: memref<1x64xf32, #tpu.memory_space<vmem>>, %arg4: memref<64x128xf32, #tpu.memory_space<vmem>>, %arg5: memref<1x128xf32, #tpu.memory_space<vmem>>, %arg6: memref<8x128xf32, #tpu.memory_space<vmem>>) attributes {dimension_semantics = [#tpu.dimension_semantics<parallel>], iteration_bounds = array<i64: 2>, scalar_prefetch = 0 : i64, scratch_operands = 0 : i64, tpu.core_type = #tpu.core_type<tc>, window_params = [{transform_indices = @transform_0, window_bounds = array<i64: 8, 128>}, {pipeline_mode = #tpu.pipeline_mode<synchronous>, transform_indices = @transform_1, window_bounds = array<i64: 128, 64>}, {pipeline_mode = #tpu.pipeline_mode<synchronous>, transform_indices = @transform_2, window_bounds = array<i64: 1, 64>}, {pipeline_mode = #tpu.pipeline_mode<synchronous>, transform_indices = @transform_3, window_bounds = array<i64: 64, 128>}, {pipeline_mode = #tpu.pipeline_mode<synchronous>, transform_indices = @transform_4, window_bounds = array<i64: 1, 128>}, {transform_indices = @transform_5, window_bounds = array<i64: 8, 128>}]} {
    %c0 = arith.constant 0 : index
    %c0_0 = arith.constant 0 : index
    %0 = vector.load %arg1[%c0, %c0_0] : memref<8x128xf32, #tpu.memory_space<vmem>>, vector<8x128xf32>
    %c0_1 = arith.constant 0 : index
    %c0_2 = arith.constant 0 : index
    %1 = vector.load %arg2[%c0_1, %c0_2] : memref<128x64xf32, #tpu.memory_space<vmem>>, vector<128x64xf32>
    %cst = arith.constant dense<0.000000e+00> : vector<8x64xf32>
    %2 = tpu.matmul %0, %1, %cst {dimension_numbers = #tpu.dot_dimension_numbers<[1], [0], [0], [1], [0, 0, 1, 1], [], []>} : vector<8x128xf32>, vector<128x64xf32>, vector<8x64xf32> -> vector<8x64xf32>
    %c0_3 = arith.constant 0 : index
    %c0_4 = arith.constant 0 : index
    %3 = vector.load %arg3[%c0_3, %c0_4] : memref<1x64xf32, #tpu.memory_space<vmem>>, vector<1x64xf32>
    %4 = vector.broadcast %3 : vector<1x64xf32> to vector<8x64xf32>
    %5 = arith.addf %2, %4 : vector<8x64xf32>
    %cst_5 = arith.constant 0.000000e+00 : f32
    %6 = vector.broadcast %cst_5 : f32 to vector<8x64xf32>
    %7 = arith.maximumf %5, %6 : vector<8x64xf32>
    %c0_6 = arith.constant 0 : index
    %c0_7 = arith.constant 0 : index
    %8 = vector.load %arg4[%c0_6, %c0_7] : memref<64x128xf32, #tpu.memory_space<vmem>>, vector<64x128xf32>
    %cst_8 = arith.constant dense<0.000000e+00> : vector<8x128xf32>
    %9 = tpu.matmul %7, %8, %cst_8 {dimension_numbers = #tpu.dot_dimension_numbers<[1], [0], [0], [1], [0, 0, 1, 1], [], []>} : vector<8x64xf32>, vector<64x128xf32>, vector<8x128xf32> -> vector<8x128xf32>
    %c0_9 = arith.constant 0 : index
    %c0_10 = arith.constant 0 : index
    %10 = vector.load %arg5[%c0_9, %c0_10] : memref<1x128xf32, #tpu.memory_space<vmem>>, vector<1x128xf32>
    %11 = vector.broadcast %10 : vector<1x128xf32> to vector<8x128xf32>
    %12 = arith.addf %9, %11 : vector<8x128xf32>
    %c0_11 = arith.constant 0 : index
    %c0_12 = arith.constant 0 : index
    %13 = vector.load %arg6[%c0_11, %c0_12] : memref<8x128xf32, #tpu.memory_space<vmem>>, vector<8x128xf32>
    tpu.vector_store %arg6[%c0_11, %c0_12], %12 {strides = array<i32>} : memref<8x128xf32, #tpu.memory_space<vmem>>, vector<8x128xf32>,
    return
  }
  func.func @transform_0(%arg0: i32) -> (i32, i32) {
    %c0_i32 = arith.constant 0 : i32
    %c0_i32_0 = arith.constant 0 : i32
    return %arg0, %c0_i32 : i32, i32
  }
  func.func @transform_1(%arg0: i32) -> (i32, i32) {
    %c0_i32 = arith.constant 0 : i32
    %c0_i32_0 = arith.constant 0 : i32
    %c0_i32_1 = arith.constant 0 : i32
    return %c0_i32, %c0_i32_0 : i32, i32
  }
  func.func @transform_2(%arg0: i32) -> (i32, i32) {
    %c0_i32 = arith.constant 0 : i32
    %c0_i32_0 = arith.constant 0 : i32
    %c0_i32_1 = arith.constant 0 : i32
    return %c0_i32, %c0_i32_0 : i32, i32
  }
  func.func @transform_3(%arg0: i32) -> (i32, i32) {
    %c0_i32 = arith.constant 0 : i32
    %c0_i32_0 = arith.constant 0 : i32
    %c0_i32_1 = arith.constant 0 : i32
    return %c0_i32, %c0_i32_0 : i32, i32
  }
  func.func @transform_4(%arg0: i32) -> (i32, i32) {
    %c0_i32 = arith.constant 0 : i32
    %c0_i32_0 = arith.constant 0 : i32
    %c0_i32_1 = arith.constant 0 : i32
    return %c0_i32, %c0_i32_0 : i32, i32
  }
  func.func @transform_5(%arg0: i32) -> (i32, i32) {
    %c0_i32 = arith.constant 0 : i32
    %c0_i32_0 = arith.constant 0 : i32
    return %arg0, %c0_i32 : i32, i32
  }
}

</mosaic_0001>

<bundles_post_ra>
// kernel: tpu_custom_call.1
= control target key start
LH: loop header
LB: loop body
LE: loop exit
PB: predicated region body
PF: predicated region fallthrough
CT: control target
= control target key end

     0   :  { %10 = vsyncpa [#allocation3], 0  ;;  %s683_s0 = inlined_call_operand.vmem [shape: f32[16,128], index: 0, kind: input, shape index: {}]   ;;  %s684_s1 = inlined_call_operand.vmem [shape: f32[128,64], index: 1, kind: input, shape index: {}]   ;;  %s685_s2 = inlined_call_operand.vmem [shape: f32[1,64], index: 2, kind: input, shape index: {}]   ;;  %s686_s3 = inlined_call_operand.vmem [shape: f32[64,128], index: 3, kind: input, shape index: {}]   ;;  %s687_s4 = inlined_call_operand.vmem [shape: f32[1,128], index: 4, kind: input, shape index: {}]   ;;  %s688_s5 = inlined_call_operand.hbm [shape: f32[16,128], index: 5, kind: output, shape index: {}]  }
   0x1   :  { %12 = vsyncpa [#allocation3 + $0x1], 0  ;;  %s520_s18 = smov 0   ;;  %s522_s19 = smov 0  }
   0x2   :  { %s524_s20 = smov 0   ;;  %s526_s21 = smov 0  }
   0x3 LB: > { %s541_s22 = sadd.s32 4294967295, %s488_s21   ;;  %s374_s23 = sadd.s32 4294967294, %s488_s21   ;;  %s488_s21 = sphi %s526_s21, %s694_s21   ;;  %s484_s20 = sphi %s524_s20, %s693_s20   ;;  %s480_s19 = sphi %s522_s19, %s692_s19   ;;  %s476_s18 = sphi %s520_s18, %s691_s18  }
   0x4   : > { %s545_s24 = sadd.s32 1, %s488_s21   ;;  %s135_s25 = sadd.s32 1, %s484_s20 }
   0x5   : > { %s132_s26 = ssub.s32 %s488_s21, %s545_s24  ;;  %p145_p0 = scmp.ne.s32.totalorder %s484_s20, %s480_s19 }
   0x6   : > { %p133_p1 = scmp.eq.s32.totalorder %s132_s26, 0  ;;  %p146_p2 = scmp.eq.s32.totalorder %s541_s22, 1 }
   0x7   : > { %p151_p3 = scmp.ne.s32.totalorder %s480_s19, %s476_s18  ;;  %p152_p4 = scmp.eq.s32.totalorder %s374_s23, 1 }
   0x8   : > { %s556_s27 = scalar_select %p133_p1, %s484_s20, %s135_s25  }
   0x9   : > { %p558_p5 = por %p146_p2, %p145_p0  ;;  %p562_p6 = por %p152_p4, %p151_p3 }
   0xa   : > { %p377_p7 = scmp.ge.s32.totalorder %s488_s21, 1  ;;  %p189_p8 = scmp.lt.s32.totalorder %s488_s21, 3 }
   0xc   : > { %p190_p9 = pnand %p377_p7, %p189_p8 }
   0xd   : > { %p216_p10 = scmp.lt.s32.totalorder (!%p190_p9), %s541_s22, 1  ;;  %s213_s12 = sand.u32 (!%p190_p9), 1, %s480_s19  }
   0xe   : > { %193 = sbr.rel (%p190_p9) target bundleno = 312 (0x138), region = 40  ;;  %s378_s13 = sshll.u32 (!%p190_p9), %s213_s12, 3 }
   0xf   : > { %s382_s14 = sshll.u32 (!%p190_p9), %s541_s22, 3  ;;  %s215_s26 = scalar_lea.vmem (!%p190_p9), [#allocation2], %s378_s13 }
  0x10   : > { %s300_s7 = scalar_lea.sflag (!%p190_p9), [#allocation3], %s213_s12  ;;  %s446_s11 = scalar_lea.hbm (!%p190_p9), %s688_s5, 16 }
  0x13   : > { %v236_v0 = vld [vmem:[%s684_s1 + $0x78] sm:$0xff]  ;;  %v235_v1 = vld [vmem:[%s684_s1 + $0x70] sm:$0xff]  ;;  %v234_v2 = vld [vmem:[%s684_s1 + $0x68] sm:$0xff]  ;;  %s217_s30 = scalar_select %p216_p10, %s541_s22, 1  ;;  %vm274_vm0 = vcmask 523264  }
  0x14   : > { %241 = vmatpush.msra.mxu0 %v236_v0  ;;  %v233_v3 = vld [vmem:[%s684_s1 + $0x60] sm:$0xff]  ;;  %v269_v4 = vld [vmem:[%s686_s3 + $0x38] sm:$0xff]  ;;  %v268_v5 = vld [vmem:[%s686_s3 + $0x30] sm:$0xff] }
  0x15   : > { %v232_v6 = vld [vmem:[%s684_s1 + $0x58] sm:$0xff]  ;;  %286 = vmatpush.msra.mxu1 %v269_v4  ;;  %v267_v7 = vld [vmem:[%s686_s3 + $0x28] sm:$0xff]  ;;  %v231_v8 = vld [vmem:[%s684_s1 + $0x50] sm:$0xff]  ;;  %s379_s10 = sshll.u32 %s217_s30, 3  ;;  %s312_s30 = sshll.u32 %s215_s26, 4  ;;  %s313_s30 = int_to_ptr.vmem [resolvable:$true] %s312_s30 }
  0x16   : > { %242 = vmatpush.msra.mxu0 %v235_v1  ;;  %v266_v9 = vld [vmem:[%s686_s3 + $0x20] sm:$0xff]  ;;  %v230_v10 = vld [vmem:[%s684_s1 + $0x48] sm:$0xff]  ;;  %v265_v11 = vld [vmem:[%s686_s3 + $0x18] sm:$0xff]  ;;  %s219_s17 = scalar_lea.vmem %s683_s0, %s379_s10 }
  0x17   : > { %287 = vmatpush.msra.mxu1 %v268_v5  ;;  %v229_v12 = vld [vmem:[%s684_s1 + $0x40] sm:$0xff]  ;;  %v228_v13 = vld [vmem:[%s684_s1 + $0x38] sm:$0xff]  ;;  %v227_v14 = vld [vmem:[%s684_s1 + $0x30] sm:$0xff] }
  0x18   : > { %243 = vmatpush.msra.mxu0 %v234_v2  ;;  %v226_v15 = vld [vmem:[%s684_s1 + $0x28] sm:$0xff]  ;;  %v225_v16 = vld [vmem:[%s684_s1 + $0x20] sm:$0xff]  ;;  %v224_v17 = vld [vmem:[%s684_s1 + $0x18] sm:$0xff] }
  0x19   : > { %288 = vmatpush.msra.mxu1 %v267_v7  ;;  %v223_v18 = vld [vmem:[%s684_s1 + $0x10] sm:$0xff]  ;;  %v222_v19 = vld [vmem:[%s684_s1 + $0x8] sm:$0xff]  ;;  %v221_v20 = vld [vmem:[%s684_s1] sm:$0xff] }
  0x1a   : > { %244 = vmatpush.msra.mxu0 %v233_v3  ;;  %v220_v21 = vld [vmem:[%s219_s17] sm:$0xff]  ;;  %v264_v22 = vld [vmem:[%s686_s3 + $0x10] sm:$0xff]  ;;  %v263_v23 = vld [vmem:[%s686_s3 + $0x8] sm:$0xff]  ;;  %s310_s17 = scalar_lea.hbm %s688_s5, %s382_s14 }
  0x1b   : > { %289 = vmatpush.msra.mxu1 %v266_v9  ;;  %v262_v24 = vld [vmem:[%s686_s3] sm:$0xff]  ;;  %s314_s6 = sshll.u32 %s310_s17, 4  ;;  %s315_s6 = int_to_ptr.hbm [resolvable:$true] %s314_s6 }
  0x1c   : > { %245 = vmatpush.msra.mxu0 %v232_v6  ;;  %v424_v25 = vld [vmem:[%s685_s2] ss:$0 sm:$0xff]  ;;  %s440_s8 = sshra.s32 %s315_s6, 4  ;;  %s441_s8 = int_to_ptr.hbm [resolvable:$true] %s440_s8 }
  0x1d   : > { %290 = vmatpush.msra.mxu1 %v265_v11  ;;  %v425_v29 = vld [vmem:[%s687_s4] ss:$0 sm:$0xff]  ;;  %s442_s22 = scalar_lea.hbm %s441_s8, 8  ;;  %p447_p0 = scmp.lt.s32.totalorder %s441_s8, %s688_s5 }
  0x1e   : > { %246 = vmatpush.msra.mxu0 %v231_v8  ;;  %p443_p11 = scmp.ne.s32.totalorder %s441_s8, %s442_s22  ;;  %p448_p1 = scmp.lt.s32.totalorder %s446_s11, %s442_s22 }
  0x1f   : > { %291 = vmatpush.msra.mxu1 %v264_v22 }
  0x20   : > { %247 = vmatpush.msra.mxu0 %v230_v10  ;;  %p444_p12 = pnand %p443_p11, %p558_p5  ;;  %p449_p2 = por %p448_p1, %p447_p0 }
  0x21   : > { %292 = vmatpush.msra.mxu1 %v263_v23 }
  0x22   : > { %248 = vmatpush.msra.mxu0 %v229_v12  ;;  %p445_p13 = pneg %p444_p12 }
  0x23   : > { %293 = vmatpush.msra.mxu1 %v262_v24 }
  0x24   : > { %249 = vmatpush.msra.mxu0 %v228_v13  ;;  %p450_p3 = pnand %p449_p2, %p445_p13 }
  0x26   : > { %250 = vmatpush.msra.mxu0 %v227_v14 }
  0x28   : > { %251 = vmatpush.msra.mxu0 %v226_v15 }
  0x2a   : > { %252 = vmatpush.msra.mxu0 %v225_v16 }
  0x2c   : > { %253 = vmatpush.msra.mxu0 %v224_v17 }
  0x2e   : > { %254 = vmatpush.msra.mxu0 %v223_v18 }
  0x30   : > { %255 = vmatpush.msra.mxu0 %v222_v19 }
  0x32   : > { %256 = vmatpush.msra.mxu0 %v221_v20 }
  0x33   : > { %257 = vmatmul.f32.vlgmr.msra.gmra.mxu0 %v220_v21 }
  0xb0   : > { %v258_v26 = vpop.f32.mrf.mxu0 }
  0xb1   : > { %v259_v27 = vadd.f32 %v424_v25, %v258_v26 }
  0xb3   : > { %v261_v28 = vmax.f32 %v259_v27, 0.0 }
  0xb5   : > { %380 = vmatmul.msk.f32.vlgmr.msra.gmra.mxu1 %vm274_vm0, %v261_v28 }
 0x132   : > { %v295_v30 = vpop.f32.mrf.mxu1 }
 0x133   : > { %v296_v31 = vadd.f32 %v425_v29, %v295_v30 }
 0x135   : > { %298 = vst [vmem:[%s215_s26] sm:$0xff] %v296_v31 }
 0x136   : > { %453 = shalt.err (!%p450_p3)
}
 0x137   : > { %385 = dma.vmem_to_hbm [thread:$0]  (%p558_p5), %s313_s30, 128, %s315_s6, %s300_s7  }
 0x138 PF: > { %p391_p4 = scmp.ge.s32.totalorder %s488_s21, 2  ;;  %s326_s12 = sand.u32 1, %s476_s18  }
 0x139   : > { %s327_s15 = scalar_lea.sflag [#allocation3], %s326_s12 }
 0x13a   : > { %p388_p7 = pnand %p391_p4, %p562_p6 }
 0x13c   : > { %p389_p8 = pneg %p388_p7 }
 0x13e   : > { %471 = dma.done.wait (%p389_p8), %s327_s15, 128  }
 0x13f   : > { %473 = vsyncadd (%p389_p8), %s327_s15, 4294967168  ;;  %p15_p9 = scmp.ge.s32.totalorder %s545_s24, 4   ;;  %s691_s18 = smov %s480_s19 }
 0x140   : > { %s692_s19 = smov %s484_s20  ;;  %s693_s20 = smov %s556_s27 }
 0x141   : > { %s694_s21 = smov %s545_s24  ;;  %17 = sbr.rel (!%p15_p9) target bundleno = 3 (0x3), region = 75 }
 0x146   :  { %333 = vsyncpa [#allocation3], 1 }
 0x147   :  { %335 = vsyncpa [#allocation3 + $0x1], 1 }

</bundles_post_ra>
